<compile_context>
chip_gen: v5e
topology: v5e:2x2
jax: 0.10.0
libtpu: 0.0.40
codegen_flags: <defaults>
</compile_context>

<pallas_src>
import functools
import math

import jax
import jax.numpy as jnp
from jax.experimental import pallas as pl
from jax.experimental.pallas import tpu as pltpu


def _gem_kernel(p_ref, x_ref, o_ref, *, eps, hw, n_pad_cols):
    # p_ref: (1, 1) f32 in SMEM (the learnable GeM exponent)
    # x_ref: (TM, HW_pad) tile of the flattened (lane-padded) input in VMEM
    # o_ref: (TM, 1) pooled output tile
    p = p_ref[0, 0]
    inv_p = 1.0 / p

    x = x_ref[...].astype(jnp.float32)
    xc = jnp.maximum(x, eps)                         # clamp(min=eps); xc > 0
    xp = jnp.exp(p * jnp.log(xc))                    # xc ** p (traced exponent)
    s = jnp.sum(xp, axis=-1, keepdims=True)          # row sum over (H, W) + pad

    if n_pad_cols:
        # Padded columns were zeros -> clamped to eps -> each contributed
        # eps**p to the sum.  Subtract that exactly (scalar per tile).
        s = s - jnp.float32(n_pad_cols) * jnp.exp(p * math.log(eps))

    # mean^(1/p) == exp((log(sum) - log(HW)) / p)    (1/HW folded into epilogue)
    o_ref[...] = jnp.exp((jnp.log(s) - math.log(hw)) * inv_p).astype(o_ref.dtype)


def _vmem_capacity_bytes():
    """Per-core VMEM capacity; conservative (v7x, 64 MiB) fallback."""
    try:
        return int(pltpu.get_tpu_info().vmem_capacity_bytes)
    except Exception:  # query unavailable -> assume the smallest current core
        return 64 * (1 << 20)


def _pick_row_tile(nc, hw_pad, itemsize, vmem_limit_bytes, target_tile_bytes):
    """Row tile targeting multi-MiB input tiles under the scoped-VMEM budget."""
    row_in_bytes = hw_pad * itemsize
    # ~6-8 MiB input tiles amortize the ~0.35 us/step pipeline overhead.
    tm_target = max(8, target_tile_bytes // row_in_bytes)
    # Working set per row: 2 double-buffered input copies + ~3 live f32
    # elementwise temporaries (xc / p*log / xp), plus ~4 MiB global slack.
    per_row_ws = hw_pad * (2 * itemsize + 3 * 4)
    tm_vmem = max(8, (vmem_limit_bytes - (4 << 20)) // per_row_ws)
    # Keep >= ~8 grid steps when NC allows it, so v7x's two TensorCores each
    # get >= 2 pipelined steps (double-buffering engaged per core).
    tm_steps = ((pl.cdiv(nc, 8) + 7) // 8) * 8
    tm = min(tm_target, tm_vmem, tm_steps)
    return int(max(8, (tm // 8) * 8))


def gem_pallas(x, p, eps=1e-6):
    """GeM pooling. x: (N, C, H, W); p: (1,) learnable exponent. Returns (N, C, 1, 1)."""
    N, C, H, W = x.shape
    NC, HW = N * C, H * W

    x2 = x.reshape(NC, HW)                           # free: NCHW is row-major contiguous

    # Lane-dense input: pad HW up to a multiple of 128 with zeros so the VMEM
    # block isn't lane-masked and per-row DMAs stay >= 512 B contiguous.  The
    # exact padded contribution is subtracted inside the kernel.
    HW_pad = ((HW + 127) // 128) * 128
    n_pad_cols = HW_pad - HW
    if n_pad_cols:
        x2 = jnp.pad(x2, ((0, 0), (0, n_pad_cols)))

    # Generation-aware VMEM budget (v5e/v6e: 128 MiB per core, v7x: 64 MiB).
    vmem_cap = _vmem_capacity_bytes()
    if vmem_cap >= 100 * (1 << 20):                  # v5e / v6e
        vmem_limit = 64 << 20
        target_tile = 8 << 20
    else:                                            # v7x
        vmem_limit = 32 << 20
        target_tile = 6 << 20

    TM = _pick_row_tile(NC, HW_pad, x2.dtype.itemsize, vmem_limit, target_tile)

    p2 = jnp.asarray(p, jnp.float32).reshape(1, 1)

    out2 = pl.pallas_call(
        functools.partial(_gem_kernel, eps=float(eps), hw=float(HW),
                          n_pad_cols=int(n_pad_cols)),
        out_shape=jax.ShapeDtypeStruct((NC, 1), x.dtype),
        grid_spec=pltpu.PrefetchScalarGridSpec(
            num_scalar_prefetch=0,
            grid=(pl.cdiv(NC, TM),),                 # partial last block OK (masked store)
            in_specs=[
                pl.BlockSpec(memory_space=pltpu.SMEM),        # p (whole array in SMEM)
                pl.BlockSpec((TM, HW_pad), lambda i: (i, 0)),  # x row tile, full width
            ],
            out_specs=pl.BlockSpec((TM, 1), lambda i: (i, 0)),
        ),
        compiler_params=pltpu.CompilerParams(
            dimension_semantics=("parallel",),
            vmem_limit_bytes=vmem_limit,
        ),
    )(p2, x2)

    return out2.reshape(N, C, 1, 1)


def gem_reference(x, p, eps=1e-6):
    """Pure-JAX reference mirroring the PyTorch gem()."""
    xc = jnp.maximum(x.astype(jnp.float32), eps)
    m = jnp.mean(xc ** p, axis=(-2, -1), keepdims=True)
    return (m ** (1.0 / p)).astype(x.dtype)


if __name__ == "__main__":
    key = jax.random.PRNGKey(0)
    N, C, H, W = 2, 4, 16, 16
    x = jax.random.normal(key, (N, C, H, W), dtype=jnp.float32)

    # Deterministic parameter init, matching GeM.__init__: p = ones(1) * 3
    p = jnp.ones((1,), jnp.float32) * 3.0

    out = gem_pallas(x, p)
    out = jax.block_until_ready(out)

    ref = gem_reference(x, p[0])
    assert out.shape == (N, C, 1, 1), out.shape
    assert jnp.allclose(out, ref, rtol=1e-4, atol=1e-5), (
        float(jnp.max(jnp.abs(out - ref)))
    )

    print("KERNEL_OK")
</pallas_src>

<mosaic_0001>
module attributes {stable_mosaic.version = 11 : i64} {
  func.func @_gem_kernel(%arg0: i32, %arg1: memref<1x1xf32, #tpu.memory_space<smem>>, %arg2: memref<8x256xf32, #tpu.memory_space<vmem>>, %arg3: memref<8x1xf32, #tpu.memory_space<vmem>>) attributes {dimension_semantics = [#tpu.dimension_semantics<parallel>], iteration_bounds = array<i64: 1>, scalar_prefetch = 0 : i64, scratch_operands = 0 : i64, tpu.core_type = #tpu.core_type<tc>, window_params = [{transform_indices = @transform_0, window_bounds = array<i64: 1, 1>}, {transform_indices = @transform_1, window_bounds = array<i64: 8, 256>}, {transform_indices = @transform_2, window_bounds = array<i64: 8, 1>}]} {
    %c0 = arith.constant 0 : index
    %c0_0 = arith.constant 0 : index
    %0 = memref.load %arg1[%c0, %c0_0] : memref<1x1xf32, #tpu.memory_space<smem>>
    %cst = arith.constant 1.000000e+00 : f32
    %1 = arith.divf %cst, %0 : f32
    %c0_1 = arith.constant 0 : index
    %c0_2 = arith.constant 0 : index
    %2 = vector.load %arg2[%c0_1, %c0_2] : memref<8x256xf32, #tpu.memory_space<vmem>>, vector<8x256xf32>
    %cst_3 = arith.constant 9.99999997E-7 : f32
    %3 = vector.broadcast %cst_3 : f32 to vector<8x256xf32>
    %4 = arith.maximumf %2, %3 : vector<8x256xf32>
    %5 = math.log %4 : vector<8x256xf32>
    %6 = vector.broadcast %0 : f32 to vector<8x256xf32>
    %7 = arith.mulf %6, %5 : vector<8x256xf32>
    %8 = math.exp %7 : vector<8x256xf32>
    %cst_4 = arith.constant dense<0.000000e+00> : vector<8xf32>
    %9 = vector.multi_reduction <add>, %8, %cst_4 [1] : vector<8x256xf32> to vector<8xf32>
    %10 = vector.shape_cast %9 : vector<8xf32> to vector<8x1xf32>
    %11 = math.log %10 : vector<8x1xf32>
    %cst_5 = arith.constant 5.54517746 : f32
    %12 = vector.broadcast %cst_5 : f32 to vector<8x1xf32>
    %13 = arith.subf %11, %12 : vector<8x1xf32>
    %14 = vector.broadcast %1 : f32 to vector<8x1xf32>
    %15 = arith.mulf %13, %14 : vector<8x1xf32>
    %16 = math.exp %15 : vector<8x1xf32>
    %c0_6 = arith.constant 0 : index
    %c0_7 = arith.constant 0 : index
    %17 = vector.load %arg3[%c0_6, %c0_7] : memref<8x1xf32, #tpu.memory_space<vmem>>, vector<8x1xf32>
    tpu.vector_store %arg3[%c0_6, %c0_7], %16 {strides = array<i32>} : memref<8x1xf32, #tpu.memory_space<vmem>>, vector<8x1xf32>,
    return
  }
  func.func @transform_0(%arg0: i32) -> (i32, i32) {
    %c0_i32 = arith.constant 0 : i32
    %c0_i32_0 = arith.constant 0 : i32
    %c0_i32_1 = arith.constant 0 : i32
    return %c0_i32, %c0_i32_0 : i32, i32
  }
  func.func @transform_1(%arg0: i32) -> (i32, i32) {
    %c0_i32 = arith.constant 0 : i32
    %c0_i32_0 = arith.constant 0 : i32
    return %arg0, %c0_i32 : i32, i32
  }
  func.func @transform_2(%arg0: i32) -> (i32, i32) {
    %c0_i32 = arith.constant 0 : i32
    %c0_i32_0 = arith.constant 0 : i32
    return %arg0, %c0_i32 : i32, i32
  }
}

</mosaic_0001>

<bundles_post_ra>
// kernel: tpu_custom_call.1
= control target key start
LH: loop header
LB: loop body
LE: loop exit
PB: predicated region body
PF: predicated region fallthrough
CT: control target
= control target key end

     0   :  { %8 = vsyncpa [#allocation4], 0  ;;  %s119_s12 = smov [#allocation3]   ;;  %s144_s0 = inlined_call_operand.<no memory space> [shape: f32[1,1], index: 0, kind: input, shape index: {}]   ;;  %s145_s1 = inlined_call_operand.hbm [shape: f32[8,256], index: 1, kind: input, shape index: {}]   ;;  %s146_s2 = inlined_call_operand.vmem [shape: f32[8,1], index: 2, kind: output, shape index: {}]  }
   0x1   :  { %s16_s11 = sshll.u32 %s145_s1, 4  ;;  %s18_s13 = sshll.u32 %s119_s12, 4  ;;  %s17_s11 = int_to_ptr.hbm [resolvable:$true] %s16_s11  ;;  %s19_s13 = int_to_ptr.vmem [resolvable:$true] %s18_s13 }
   0x2   :  { %21 = dma.hbm_to_vmem [thread:$0]  %s17_s11, 256, %s19_s13, [#allocation4]  }
   0x3   :  { %117 = dma.done.wait [#allocation4], 256  }
   0x4   :  { %118 = vsyncadd [#allocation4], 4294967040  ;;  %v27_v0 = vstv %s144_s0  ;;  %v43_v2 = vld [vmem:[#allocation3] sm:$0xff]  ;;  %v44_v3 = vld [vmem:[#allocation3 + $0x8] sm:$0xff]  ;;  %vm68_vm4 = vcmask 7168  }
   0x5   :  { %79 = vrcp.f32 %v27_v0  ;;  %v45_v4 = vmax.f32 %v43_v2, 1e-06  ;;  %v46_v5 = vmax.f32 %v44_v3, 1e-06  ;;  %vm33_vm0 = vweird.f32 %v27_v0 }
   0x6   :  { %v39_v7 = vand.u32 2147483648, %v27_v0  ;;  %v37_v9 = vand.u32 2147483647, %v27_v0 }
   0x7   :  { %81 = vlog2.f32 %v45_v4 }
   0x8   :  { %83 = vlog2.f32 %v46_v5  ;;  %v40_v11 = vor.u32 1.1754944e-38, %v39_v7  ;;  %vm38_vm3 = vcmp.eq.f32.partialorder %v37_v9, 8.507059e+37 }
   0xb   :  { %v80_v1 = vpop.eup %79 }
   0xc   :  { %v29_v6 = vmul.f32 %v80_v1, %v27_v0  ;;  %vm34_vm1 = vweird.f32 %v80_v1 }
   0xd   :  { %vm35_vm2 = vmor %vm33_vm0, %vm34_vm1  ;;  %v82_v13 = vpop.eup %81 }
   0xe   :  { %v30_v8 = vsub.f32 1.0, %v29_v6  ;;  %v84_v15 = vpop.eup %83  ;;  %v48_v16 = vmul.f32 0.6931472, %v82_v13 }
   0xf   :  { %v50_v18 = vmul.f32 0.6931472, %v84_v15 }
  0x10   :  { %v31_v10 = vmul.f32 %v80_v1, %v30_v8  ;;  %v52_v19 = vmul.f32 %v48_v16, %v27_v0 }
  0x11   :  { %v53_v20 = vmul.f32 %v50_v18, %v27_v0 }
  0x12   :  { %v32_v12 = vadd.f32 %v80_v1, %v31_v10  ;;  %v54_v21 = vmul.f32 1.442695, %v52_v19 }
  0x13   :  { %v56_v22 = vmul.f32 1.442695, %v53_v20 }
  0x14   :  { %v36_v14 = vsel %vm35_vm2, %v80_v1, %v32_v12  ;;  %85 = vpow2.f32 %v54_v21 }
  0x15   :  { %v41_v17 = vsel %vm38_vm3, %v40_v11, %v36_v14  ;;  %87 = vpow2.f32 %v56_v22 }
  0x16   :  { %76 = vpush %v41_v17 }
  0x1a   :  { %v86_v23 = vpop.eup %85 }
  0x1b   :  { %v88_v24 = vpop.eup %87 }
  0x1c   :  { %v58_v25 = vadd.f32 %v88_v24, %v86_v23 }
  0x1e   :  { %59 = vadd.xlane.f32.xlu0 %v58_v25 }
  0x47   :  { %s77_s0 = spop %76 }
  0x48   :  { %v64_v29 = vstv %s77_s0 }
  0x91   :  { %v60_v26 = vpop.xlane.xlu0 %59 }
  0x92   :  { %89 = vlog2.f32 %v60_v26 }
  0x98   :  { %v90_v27 = vpop.eup %89 }
  0x99   :  { %v62_v28 = vmul.f32 0.6931472, %v90_v27 }
  0x9b   :  { %v75_v30 = vadd.f32 -5.5451775, %v62_v28 }
  0x9d   :  { %v65_v31 = vmul.f32 %v75_v30, %v64_v29 }
  0x9f   :  { %v66_v32 = vmul.f32 1.442695, %v65_v31 }
  0xa1   :  { %91 = vpow2.f32 %v66_v32 }
  0xa7   :  { %v92_v33 = vpop.eup %91 }
  0xa8   :  { %69 = vst.msk [vmem:[%s146_s2] sm:$0xff] %vm68_vm4, %v92_v33 }
  0xa9   :  { %74 = vsyncpa [#allocation4], 1 }

</bundles_post_ra>
